<compile_context>
chip_gen: v6e
topology: v6e:2x2x1
jax: 0.10.0
libtpu: 0.0.40
codegen_flags: <defaults>
</compile_context>

<pallas_src>
import jax
import jax.numpy as jnp
from jax.experimental import pallas as pl
from jax.experimental.pallas import tpu as pltpu


def _choose_batch_block(nc, bytes_per_plane_pair, vmem_budget=8 << 20, min_steps=2):
    """Largest divisor of nc whose double-buffered in+out blocks fit the VMEM
    budget, capped so the grid keeps >= min_steps steps when possible."""
    max_b = max(1, vmem_budget // max(1, bytes_per_plane_pair))
    if nc >= min_steps:
        max_b = min(max_b, max(1, nc // min_steps))
    max_b = int(min(max_b, nc))
    b = 1
    for d in range(1, max_b + 1):
        if nc % d == 0:
            b = d
    return b


def _make_pad_kernel(H, W, pad, Wo):
    def pad_kernel(x_ref, o_ref):
        # x_ref: (B, H, W)   o_ref: (B, Ho, Wo) with Ho = H + 2*pad
        x = x_ref[...]
        if pad == 0:
            o_ref[...] = x
            return
        B = x_ref.shape[0]
        # Bulk interior: plain (unmasked) stores.
        o_ref[:, pad:pad + H, pad:pad + W] = x
        # Circular width halos (wrap-around columns), thin masked strips.
        o_ref[:, pad:pad + H, :pad] = x[:, :, W - pad:]
        o_ref[:, pad:pad + H, pad + W:] = x[:, :, :pad]
        # Constant (zero) height halos.
        zrows = jnp.zeros((B, pad, Wo), dtype=x.dtype)
        o_ref[:, :pad, :] = zrows
        o_ref[:, pad + H:, :] = zrows

    return pad_kernel


def custom_pad2d(x, kern_size, padding_type="Cons"):
    """Pallas implementation of CustomPad2d.forward.

    x: (N, C, H, W). Width is padded circularly by p=(kern_size-1)//2 on both
    sides, then height is padded with zeros by p on both sides (only 'Cons'
    padding_type is supported, matching the PyTorch module).
    """
    if padding_type != "Cons":
        raise RuntimeError("ERROR - NO Padding style given!!!")

    pad = int((kern_size - 1) / 2)   # same truncation as the PyTorch module
    N, C, H, W = x.shape
    if pad > W:
        # torch's circular pad has the same requirement.
        raise ValueError("circular padding requires pad_size <= W")

    Ho, Wo = H + 2 * pad, W + 2 * pad
    NC = N * C
    itemsize = jnp.dtype(x.dtype).itemsize

    # x2 for the pipeline's double buffering of both the input and output block.
    bytes_per_plane_pair = 2 * (H * W + Ho * Wo) * itemsize
    B = _choose_batch_block(NC, bytes_per_plane_pair)
    grid = (NC // B,)

    x_flat = x.reshape(NC, H, W)
    kernel = _make_pad_kernel(H, W, pad, Wo)

    cost = pl.CostEstimate(
        flops=0,
        transcendentals=0,
        bytes_accessed=(NC * H * W + NC * Ho * Wo) * itemsize,
    )

    out_flat = pl.pallas_call(
        kernel,
        out_shape=jax.ShapeDtypeStruct((NC, Ho, Wo), x.dtype),
        grid_spec=pltpu.PrefetchScalarGridSpec(
            num_scalar_prefetch=0,
            grid=grid,
            in_specs=[pl.BlockSpec((B, H, W), lambda i: (i, 0, 0))],
            out_specs=pl.BlockSpec((B, Ho, Wo), lambda i: (i, 0, 0)),
        ),
        compiler_params=pltpu.CompilerParams(
            dimension_semantics=("parallel",),
        ),
        cost_estimate=cost,
    )(x_flat)

    return out_flat.reshape(N, C, Ho, Wo)


def _reference(x, kern_size):
    # Pure-JAX reference mirroring torch.nn.functional.pad semantics.
    pad = int((kern_size - 1) / 2)
    if pad == 0:
        return x
    x = jnp.concatenate([x[..., -pad:], x, x[..., :pad]], axis=-1)  # circular W
    x = jnp.pad(x, ((0, 0), (0, 0), (pad, pad), (0, 0)))            # constant H
    return x


if __name__ == "__main__":
    key = jax.random.PRNGKey(0)
    N, C, H, W = 2, 4, 16, 16
    kern_size = 3  # pad_size = 1

    x = jax.random.normal(key, (N, C, H, W), dtype=jnp.float32)

    y = custom_pad2d(x, kern_size, padding_type="Cons")
    y = jax.block_until_ready(y)

    y_ref = _reference(x, kern_size)
    assert y.shape == (N, C, H + 2, W + 2), y.shape
    assert jnp.allclose(y, y_ref), "mismatch vs reference"

    print("KERNEL_OK")
</pallas_src>

<mosaic_0001>
module attributes {stable_mosaic.version = 11 : i64} {
  func.func @pad_kernel(%arg0: i32, %arg1: memref<4x16x16xf32, #tpu.memory_space<vmem>>, %arg2: memref<4x18x18xf32, #tpu.memory_space<vmem>>) attributes {dimension_semantics = [#tpu.dimension_semantics<parallel>], iteration_bounds = array<i64: 2>, scalar_prefetch = 0 : i64, scratch_operands = 0 : i64, tpu.core_type = #tpu.core_type<tc>, window_params = [{transform_indices = @transform_0, window_bounds = array<i64: 4, 16, 16>}, {transform_indices = @transform_1, window_bounds = array<i64: 4, 18, 18>}]} {
    %c0 = arith.constant 0 : index
    %c0_0 = arith.constant 0 : index
    %c0_1 = arith.constant 0 : index
    %0 = vector.load %arg1[%c0, %c0_0, %c0_1] : memref<4x16x16xf32, #tpu.memory_space<vmem>>, vector<4x16x16xf32>
    %c0_2 = arith.constant 0 : index
    %c1 = arith.constant 1 : index
    %c1_3 = arith.constant 1 : index
    %1 = vector.load %arg2[%c0_2, %c1, %c1_3] : memref<4x18x18xf32, #tpu.memory_space<vmem>>, vector<4x16x16xf32>
    tpu.vector_store %arg2[%c0_2, %c1, %c1_3], %0 {strides = array<i32>} : memref<4x18x18xf32, #tpu.memory_space<vmem>>, vector<4x16x16xf32>,
    %2 = vector.extract_strided_slice %0 {offsets = [0, 0, 15], sizes = [4, 16, 1], strides = [1, 1, 1]} : vector<4x16x16xf32> to vector<4x16x1xf32>
    %c0_4 = arith.constant 0 : index
    %c1_5 = arith.constant 1 : index
    %c0_6 = arith.constant 0 : index
    %3 = vector.load %arg2[%c0_4, %c1_5, %c0_6] : memref<4x18x18xf32, #tpu.memory_space<vmem>>, vector<4x16x1xf32>
    tpu.vector_store %arg2[%c0_4, %c1_5, %c0_6], %2 {strides = array<i32>} : memref<4x18x18xf32, #tpu.memory_space<vmem>>, vector<4x16x1xf32>,
    %4 = vector.extract_strided_slice %0 {offsets = [0, 0, 0], sizes = [4, 16, 1], strides = [1, 1, 1]} : vector<4x16x16xf32> to vector<4x16x1xf32>
    %c0_7 = arith.constant 0 : index
    %c1_8 = arith.constant 1 : index
    %c17 = arith.constant 17 : index
    %5 = vector.load %arg2[%c0_7, %c1_8, %c17] : memref<4x18x18xf32, #tpu.memory_space<vmem>>, vector<4x16x1xf32>
    tpu.vector_store %arg2[%c0_7, %c1_8, %c17], %4 {strides = array<i32>} : memref<4x18x18xf32, #tpu.memory_space<vmem>>, vector<4x16x1xf32>,
    %cst = arith.constant 0.000000e+00 : f32
    %6 = vector.broadcast %cst : f32 to vector<4x1x18xf32>
    %c0_9 = arith.constant 0 : index
    %c0_10 = arith.constant 0 : index
    %c0_11 = arith.constant 0 : index
    %7 = vector.load %arg2[%c0_9, %c0_10, %c0_11] : memref<4x18x18xf32, #tpu.memory_space<vmem>>, vector<4x1x18xf32>
    tpu.vector_store %arg2[%c0_9, %c0_10, %c0_11], %6 {strides = array<i32>} : memref<4x18x18xf32, #tpu.memory_space<vmem>>, vector<4x1x18xf32>,
    %c0_12 = arith.constant 0 : index
    %c17_13 = arith.constant 17 : index
    %c0_14 = arith.constant 0 : index
    %8 = vector.load %arg2[%c0_12, %c17_13, %c0_14] : memref<4x18x18xf32, #tpu.memory_space<vmem>>, vector<4x1x18xf32>
    tpu.vector_store %arg2[%c0_12, %c17_13, %c0_14], %6 {strides = array<i32>} : memref<4x18x18xf32, #tpu.memory_space<vmem>>, vector<4x1x18xf32>,
    return
  }
  func.func @transform_0(%arg0: i32) -> (i32, i32, i32) {
    %c0_i32 = arith.constant 0 : i32
    %c0_i32_0 = arith.constant 0 : i32
    %c0_i32_1 = arith.constant 0 : i32
    return %arg0, %c0_i32, %c0_i32_0 : i32, i32, i32
  }
  func.func @transform_1(%arg0: i32) -> (i32, i32, i32) {
    %c0_i32 = arith.constant 0 : i32
    %c0_i32_0 = arith.constant 0 : i32
    %c0_i32_1 = arith.constant 0 : i32
    return %arg0, %c0_i32, %c0_i32_0 : i32, i32, i32
  }
}

</mosaic_0001>

<bundles_post_ra>
// kernel: tpu_custom_call.1
= control target key start
LH: loop header
LB: loop body
LE: loop exit
PB: predicated region body
PF: predicated region fallthrough
CT: control target
= control target key end

     0   :  { %6 = vsyncpa [#allocation3], 0  ;;  %s654_s0 = inlined_call_operand.hbm [shape: f32[8,16,16], index: 0, kind: input, shape index: {}]   ;;  %s655_s1 = inlined_call_operand.vmem [shape: f32[8,18,18], index: 1, kind: output, shape index: {}]  }
   0x1   :  { %8 = vsyncpa [#allocation3 + $0x1], 0  ;;  %s478_s6 = smov 0   ;;  %s480_s7 = smov 0  }
   0x2   :  { %s482_s8 = smov 0   ;;  %s484_s9 = smov 0  }
   0x3 LB: > { %s335_s10 = sadd.s32 4294967295, %s459_s9   ;;  %s498_s11 = sadd.s32 1, %s459_s9   ;;  %s459_s9 = sphi %s484_s9, %s664_s9   ;;  %s455_s8 = sphi %s482_s8, %s663_s8   ;;  %s451_s7 = sphi %s480_s7, %s662_s7   ;;  %s447_s6 = sphi %s478_s6, %s661_s6  }
   0x4   : > { %s18_s12 = ssub.s32 %s459_s9, %s498_s11  ;;  %s21_s13 = sadd.s32 1, %s455_s8 }
   0x5   : > { %p19_p0 = scmp.eq.s32.totalorder %s18_s12, 0  ;;  %p28_p1 = scmp.ne.s32.totalorder %s455_s8, %s451_s7 }
   0x6   : > { %p29_p2 = scmp.eq.s32.totalorder %s459_s9, 0  ;;  %p34_p3 = scmp.ne.s32.totalorder %s451_s7, %s447_s6 }
   0x7   : > { %s508_s14 = scalar_select %p19_p0, %s455_s8, %s21_s13  }
   0x8   : > { %p30_p4 = por %p29_p2, %p28_p1  ;;  %p35_p5 = scmp.eq.s32.totalorder %s335_s10, 0 }
   0x9   : > { %p358_p6 = scmp.lt.s32.totalorder %s459_s9, 2  ;;  %s84_s16 = sand.u32 1, %s455_s8  }
   0xa   : > { %p513_p7 = por %p35_p5, %p34_p3  ;;  %s339_s17 = sshll.u32 %s84_s16, 6 }
   0xb   : > { %s350_s18 = sshll.u32 %s459_s9, 10  ;;  %s88_s22 = scalar_lea.vmem [#allocation2], %s339_s17 }
   0xc   : > { %s657_s15 = scalar_select %p513_p7, 1, 0 }
   0xd   : > { %s522_s21 = scalar_lea.hbm %s654_s0, %s350_s18  ;;  %s96_s23 = sshll.u32 %s88_s22, 4  ;;  %s524_s23 = int_to_ptr.vmem [resolvable:$true] %s96_s23 }
   0xe   : > { %p526_p8 = pnand %p358_p6, %p30_p4  ;;  %s531_s25 = scalar_lea.sflag [#allocation3], %s84_s16 }
   0xf   : > { %s397_s26 = scalar_lea.hbm %s522_s21, 1024  ;;  %s402_s29 = scalar_lea.hbm %s654_s0, 2048 }
  0x10   : > { %p398_p10 = scmp.ne.s32.totalorder %s522_s21, %s397_s26  ;;  %p399_p11 = pneg %p526_p8 }
  0x11   : > { %p403_p0 = scmp.lt.s32.totalorder %s522_s21, %s654_s0  ;;  %p404_p1 = scmp.lt.s32.totalorder %s402_s29, %s397_s26 }
  0x12   : > { %p400_p12 = pnand %p399_p11, %p398_p10 }
  0x13   : > { %p405_p2 = por %p404_p1, %p403_p0 }
  0x14   : > { %p401_p13 = pneg %p400_p12 }
  0x16   : > { %p406_p3 = pnand %p405_p2, %p401_p13 }
  0x18   : > { %409 = shalt.err (!%p406_p3)
}
  0x19   : > { %s410_s3 = scalar_lea.vmem %s524_s23, 1024  ;;  %s461_s4 = smov [#allocation2]  }
  0x1a   : > { %p411_p4 = scmp.ne.s32.totalorder %s524_s23, %s410_s3  ;;  %s415_s5 = sshll.u32 %s461_s4, 4  ;;  %s416_s5 = int_to_ptr.vmem [resolvable:$false] %s415_s5 }
  0x1b   : > { %s417_s6 = scalar_lea.vmem %s416_s5, 2048  ;;  %p418_p10 = scmp.lt.s32.totalorder %s524_s23, %s416_s5 }
  0x1c   : > { %p413_p5 = pnand %p411_p4, %p399_p11  ;;  %p419_p12 = scmp.lt.s32.totalorder %s417_s6, %s410_s3 }
  0x1e   : > { %p414_p6 = pneg %p413_p5  ;;  %p420_p9 = por %p419_p12, %p418_p10 }
  0x20   : > { %p421_p7 = pnand %p420_p9, %p414_p6 }
  0x22   : > { %424 = shalt.err (!%p421_p7)
}
  0x23   : > { %s462_s12 = smov 128   ;;  %s463_s13 = smov 8  }
  0x24   : > { %357 = dma.hbm_to_vmem [thread:$0]  (!%p526_p8), %s522_s21, 1024, %s524_s23, %s531_s25, %s462_s12, %s462_s12, %s463_s13  }
  0x25   : > { %p104_p11 = scmp.lt.s32.totalorder %s459_s9, 3  ;;  %p659_p13 = scmp.ge.s32.totalorder %s459_s9, 1 }
  0x27   : > { %p105_p0 = pnand %p659_p13, %p104_p11 }
  0x28   : > { %s110_s16 = sand.u32 (!%p105_p0), 1, %s451_s7   ;;  %p660_p7 = scmp.ne.s32.totalorder (!%p105_p0), %s657_s15, 0 }
  0x29   : > { %108 = sbr.rel (%p105_p0) target bundleno = 209 (0xd1), region = 24  ;;  %s344_s17 = sshll.u32 (!%p105_p0), %s110_s16, 6 }
  0x2a   : > { %s111_s18 = scalar_lea.sflag (!%p105_p0), [#allocation3], %s110_s16  ;;  %s556_s19 = scalar_lea.vmem (!%p105_p0), [#allocation2], %s344_s17 }
  0x2e   : > { %442 = dma.done.wait (%p660_p7), %s111_s18, 1024  }
  0x2f   : > { %444 = vsyncadd (%p660_p7), %s111_s18, 4294966272  ;;  %s345_s20 = sshll.u32 %s335_s10, 2  ;;  %vm257_vm0 = vcmask 139264   ;;  %v144_v0 = vld [vmem:[%s556_s19 + $0x10] sm:$0xff]  ;;  %v142_v1 = vld [vmem:[%s556_s19] sm:$0xff]  ;;  %v464_v2 = vmov 0.0  }
  0x30   : > { %p136_p8 = scmp.lt.s32.totalorder %s345_s20, 7  ;;  %s465_s9 = smov 1   ;;  %v145_v3 = vld [vmem:[%s556_s19 + $0x18] sm:$0xff]  ;;  %v143_v4 = vld [vmem:[%s556_s19 + $0x8] sm:$0xff]  ;;  %v146_v6 = vld [vmem:[%s556_s19 + $0x20] sm:$0xff]  ;;  %vm182_vm1 = vcmask 138248  }
  0x31   : > { %162 = vrot.lane.b32.xlu1 %v144_v0, %s465_s9  ;;  %158 = vrot.lane.b32.xlu0 %v142_v1, %s465_s9  ;;  %v147_v5 = vld [vmem:[%s556_s19 + $0x28] sm:$0xff]  ;;  %v149_v7 = vld [vmem:[%s556_s19 + $0x38] sm:$0xff]  ;;  %s466_s10 = smov 113   ;;  %s467_s15 = smov 17   ;;  %vm215_vm2 = vcmask 7168   ;;  %vm248_vm3 = vcmask 146568  }
  0x32   : > { %s666_s20 = smov (!%p136_p8, %s345_s20), 7  ;;  %v148_v8 = vld [vmem:[%s556_s19 + $0x30] sm:$0xff] }
  0x33   : > { %s351_s21 = smul.u32 24, %s666_s20 }
  0x35   : > { %s567_s24 = scalar_lea.vmem %s655_s1, %s351_s21  ;;  %164 = vrot.lane.b32.xlu1 %v145_v3, %s465_s9  ;;  %160 = vrot.lane.b32.xlu0 %v143_v4, %s465_s9 }
  0x36   : > { %258 = vst.msk [vmem:[%s567_s24] sm:$0x1] %vm257_vm0, %v464_v2  ;;  %262 = vst.msk [vmem:[%s567_s24 + $0x11] sm:$0x1] %vm257_vm0, %v464_v2 }
  0x37   : > { %259 = vst.msk [vmem:[%s567_s24 + $0x18] sm:$0x1] %vm257_vm0, %v464_v2  ;;  %263 = vst.msk [vmem:[%s567_s24 + $0x29] sm:$0x1] %vm257_vm0, %v464_v2 }
  0x38   : > { %260 = vst.msk [vmem:[%s567_s24 + $0x30] sm:$0x1] %vm257_vm0, %v464_v2  ;;  %264 = vst.msk [vmem:[%s567_s24 + $0x41] sm:$0x1] %vm257_vm0, %v464_v2 }
  0x39   : > { %261 = vst.msk [vmem:[%s567_s24 + $0x48] sm:$0x1] %vm257_vm0, %v464_v2  ;;  %265 = vst.msk [vmem:[%s567_s24 + $0x59] sm:$0x1] %vm257_vm0, %v464_v2  ;;  %168 = vrot.lane.b32.xlu1 %v147_v5, %s465_s9  ;;  %166 = vrot.lane.b32.xlu0 %v146_v6, %s465_s9 }
  0x3d   : > { %172 = vrot.lane.b32.xlu1 %v149_v7, %s465_s9  ;;  %170 = vrot.lane.b32.xlu0 %v148_v8, %s465_s9 }
  0x41   : > { %193 = vrot.lane.b32.xlu1 %v143_v4, %s466_s10  ;;  %191 = vrot.lane.b32.xlu0 %v142_v1, %s466_s10 }
  0x45   : > { %197 = vrot.lane.b32.xlu1 %v145_v3, %s466_s10  ;;  %195 = vrot.lane.b32.xlu0 %v144_v0, %s466_s10 }
  0x49   : > { %201 = vrot.lane.b32.xlu1 %v147_v5, %s466_s10  ;;  %199 = vrot.lane.b32.xlu0 %v146_v6, %s466_s10 }
  0x4d   : > { %205 = vrot.lane.b32.xlu1 %v149_v7, %s466_s10  ;;  %203 = vrot.lane.b32.xlu0 %v148_v8, %s466_s10 }
  0x51   : > { %226 = vrot.lane.b32.xlu1 %v143_v4, %s467_s15  ;;  %224 = vrot.lane.b32.xlu0 %v142_v1, %s467_s15 }
  0x55   : > { %230 = vrot.lane.b32.xlu1 %v145_v3, %s467_s15  ;;  %228 = vrot.lane.b32.xlu0 %v144_v0, %s467_s15 }
  0x59   : > { %234 = vrot.lane.b32.xlu1 %v147_v5, %s467_s15  ;;  %232 = vrot.lane.b32.xlu0 %v146_v6, %s467_s15 }
  0x5d   : > { %238 = vrot.lane.b32.xlu1 %v149_v7, %s467_s15  ;;  %236 = vrot.lane.b32.xlu0 %v148_v8, %s467_s15 }
  0xa3   : > { %v163_v9 = vpop.permute.xlu1 %162  ;;  %v159_v10 = vpop.permute.xlu0 %158 }
  0xa4   : > { %183 = vst.msk [vmem:[%s567_s24 + $0x1] sm:$0xff] %vm182_vm1, %v159_v10  ;;  %185 = vst.msk [vmem:[%s567_s24 + $0x19] sm:$0xff] %vm182_vm1, %v163_v9 }
  0xa7   : > { %v165_v11 = vpop.permute.xlu1 %164  ;;  %v161_v12 = vpop.permute.xlu0 %160 }
  0xa8   : > { %184 = vst.msk [vmem:[%s567_s24 + $0x9] sm:$0xff] %vm182_vm1, %v161_v12  ;;  %186 = vst.msk [vmem:[%s567_s24 + $0x21] sm:$0xff] %vm182_vm1, %v165_v11 }
  0xab   : > { %v169_v13 = vpop.permute.xlu1 %168  ;;  %v167_v14 = vpop.permute.xlu0 %166 }
  0xac   : > { %188 = vst.msk [vmem:[%s567_s24 + $0x39] sm:$0xff] %vm182_vm1, %v169_v13  ;;  %187 = vst.msk [vmem:[%s567_s24 + $0x31] sm:$0xff] %vm182_vm1, %v167_v14 }
  0xaf   : > { %v173_v15 = vpop.permute.xlu1 %172  ;;  %v171_v16 = vpop.permute.xlu0 %170 }
  0xb0   : > { %190 = vst.msk [vmem:[%s567_s24 + $0x51] sm:$0xff] %vm182_vm1, %v173_v15  ;;  %189 = vst.msk [vmem:[%s567_s24 + $0x49] sm:$0xff] %vm182_vm1, %v171_v16 }
  0xb3   : > { %v194_v17 = vpop.permute.xlu1 %193  ;;  %v192_v18 = vpop.permute.xlu0 %191 }
  0xb4   : > { %217 = vst.msk [vmem:[%s567_s24 + $0x9] sm:$0xff] %vm215_vm2, %v194_v17  ;;  %216 = vst.msk [vmem:[%s567_s24 + $0x1] sm:$0xff] %vm215_vm2, %v192_v18 }
  0xb7   : > { %v198_v19 = vpop.permute.xlu1 %197  ;;  %v196_v20 = vpop.permute.xlu0 %195 }
  0xb8   : > { %219 = vst.msk [vmem:[%s567_s24 + $0x21] sm:$0xff] %vm215_vm2, %v198_v19  ;;  %218 = vst.msk [vmem:[%s567_s24 + $0x19] sm:$0xff] %vm215_vm2, %v196_v20 }
  0xbb   : > { %v202_v21 = vpop.permute.xlu1 %201  ;;  %v200_v22 = vpop.permute.xlu0 %199 }
  0xbc   : > { %221 = vst.msk [vmem:[%s567_s24 + $0x39] sm:$0xff] %vm215_vm2, %v202_v21  ;;  %220 = vst.msk [vmem:[%s567_s24 + $0x31] sm:$0xff] %vm215_vm2, %v200_v22 }
  0xbf   : > { %v206_v23 = vpop.permute.xlu1 %205  ;;  %v204_v24 = vpop.permute.xlu0 %203 }
  0xc0   : > { %223 = vst.msk [vmem:[%s567_s24 + $0x51] sm:$0xff] %vm215_vm2, %v206_v23  ;;  %222 = vst.msk [vmem:[%s567_s24 + $0x49] sm:$0xff] %vm215_vm2, %v204_v24 }
  0xc3   : > { %v227_v25 = vpop.permute.xlu1 %226  ;;  %v225_v26 = vpop.permute.xlu0 %224 }
  0xc4   : > { %250 = vst.msk [vmem:[%s567_s24 + $0x9] sm:$0xff] %vm248_vm3, %v227_v25  ;;  %249 = vst.msk [vmem:[%s567_s24 + $0x1] sm:$0xff] %vm248_vm3, %v225_v26 }
  0xc7   : > { %v231_v27 = vpop.permute.xlu1 %230  ;;  %v229_v28 = vpop.permute.xlu0 %228 }
  0xc8   : > { %252 = vst.msk [vmem:[%s567_s24 + $0x21] sm:$0xff] %vm248_vm3, %v231_v27  ;;  %251 = vst.msk [vmem:[%s567_s24 + $0x19] sm:$0xff] %vm248_vm3, %v229_v28 }
  0xcb   : > { %v235_v29 = vpop.permute.xlu1 %234  ;;  %v233_v30 = vpop.permute.xlu0 %232 }
  0xcc   : > { %254 = vst.msk [vmem:[%s567_s24 + $0x39] sm:$0xff] %vm248_vm3, %v235_v29  ;;  %253 = vst.msk [vmem:[%s567_s24 + $0x31] sm:$0xff] %vm248_vm3, %v233_v30 }
  0xcf   : > { %v239_v31 = vpop.permute.xlu1 %238  ;;  %v237_v32 = vpop.permute.xlu0 %236 }
  0xd0   : > { %256 = vst.msk [vmem:[%s567_s24 + $0x51] sm:$0xff] %vm248_vm3, %v239_v31  ;;  %255 = vst.msk [vmem:[%s567_s24 + $0x49] sm:$0xff] %vm248_vm3, %v237_v32 }
  0xd1 PF: > { %p11_p9 = scmp.ge.s32.totalorder %s498_s11, 4   ;;  %s661_s6 = smov %s451_s7 }
  0xd2   : > { %s662_s7 = smov %s455_s8  ;;  %s663_s8 = smov %s508_s14 }
  0xd3   : > { %s664_s9 = smov %s498_s11  ;;  %13 = sbr.rel (!%p11_p9) target bundleno = 3 (0x3), region = 64 }
  0xd8   :  { %290 = vsyncpa [#allocation3], 1 }
  0xd9   :  { %292 = vsyncpa [#allocation3 + $0x1], 1 }

</bundles_post_ra>
